<compile_context>
chip_gen: v7x
topology: tpu7x:2x2x1
jax: 0.10.0
libtpu: 0.0.40
codegen_flags: <defaults>
</compile_context>

<pallas_src>
import functools

import jax
import jax.numpy as jnp
import numpy as np
from jax.experimental import pallas as pl
from jax.experimental.pallas import tpu as pltpu


def _pixel_shuffle_kernel(x_ref, s_ref, o_ref, *, r, td, h, w):
    # x_ref: (r*r, td, H, W)   input channels rd*r^2 + (rh*r + rw) for the current rd
    # s_ref: (r,   W,  r*W)    bf16 scatter matrices: s[rw, w, w*r + rw] = 1
    # o_ref: (td,  H,  W*r*r)  output rows, lane index q = rh*(r*W) + w*r + rw
    rW = r * w
    f32 = jnp.float32
    slabs = []
    for rh in range(r):
        acc = None
        for rw in range(r):
            a = x_ref[rh * r + rw].reshape(td * h, w)       # fold td into matmul M dim
            if a.dtype == jnp.bfloat16:
                terms = (a,)                                # single pass, already exact
            else:
                # exact 3-way bf16 split of the (promoted) f32 value: a == t0+t1+t2
                af = a.astype(f32)
                t0 = af.astype(jnp.bfloat16)
                r1 = af - t0.astype(f32)
                t1 = r1.astype(jnp.bfloat16)
                t2 = (r1 - t1.astype(f32)).astype(jnp.bfloat16)
                terms = (t0, t1, t2)
            for t in terms:
                part = jax.lax.dot_general(
                    t, s_ref[rw],                           # bf16 x bf16 -> f32 (exact)
                    dimension_numbers=(((1,), (0,)), ((), ())),
                    preferred_element_type=f32)
                acc = part if acc is None else acc + part
        slabs.append(acc.astype(o_ref.dtype))               # (td*H, r*W)

    if r > 1 and rW % 128 == 0:
        # slab offsets are 128-aligned -> each store is already lane-dense / unmasked
        for rh in range(r):
            o_ref[:, :, rh * rW:(rh + 1) * rW] = slabs[rh].reshape(td, h, rW)
    else:
        # build the full-width row in vregs and issue ONE lane-dense store per block
        full = jnp.concatenate(slabs, axis=-1) if r > 1 else slabs[0]
        o_ref[...] = full.reshape(td, h, w * r * r)


def _vmem_capacity_bytes():
    try:
        return int(pltpu.get_tpu_info().vmem_capacity_bytes)
    except Exception:
        return 64 * 1024 * 1024     # conservative (v7x-sized) fallback


def _pick_td(D, steps_other, per_d_bytes, budget_bytes, min_steps):
    """Largest D-tile whose (in+out) block bytes fit `budget_bytes`, while keeping at
    least `min_steps` grid steps for pipelining / 2-TC sharding."""
    cap = max(1, int(budget_bytes) // max(1, per_d_bytes))
    want_d_blocks = -(-min_steps // max(1, steps_other))        # ceil
    if want_d_blocks > 1:
        cap = min(cap, max(1, D // want_d_blocks))
    cap = min(cap, D)
    best_div = max(c for c in range(1, cap + 1) if D % c == 0)
    if best_div * 2 > cap:
        return best_div          # good divisor: no partial tail block
    return cap                   # awkward D: non-divisor tile, Pallas clips the tail block


@functools.partial(jax.jit, static_argnums=(1,))
def pixel_shuffle_3d(x, upscale_factor):
    r = int(upscale_factor)
    B, Crrr, D, H, W = x.shape
    assert Crrr % (r ** 3) == 0, "channels must be divisible by upscale_factor**3"
    C = Crrr // (r ** 3)
    if r == 1:
        return x
    # TODO(synk): integer input dtypes would need a non-MXU copy path (f32 accumulation
    # truncates magnitudes > 2^24 and the v7x MXU has no integer mode).

    # free reshape (no data movement): channel axis split as (C, rd, rh, rw)
    x6 = x.reshape(B * C, r ** 3, D, H, W)

    # scatter stack: s[rw, w, w*r + rw] = 1  (0/1 is exact in bf16; RHS stays single-pass)
    col = jnp.arange(r * W)[None, None, :]
    tgt = jnp.arange(W)[None, :, None] * r + jnp.arange(r)[:, None, None]
    s = (col == tgt).astype(jnp.bfloat16)

    # generation-aware tiling budgets
    vmem_cap = _vmem_capacity_bytes()
    vmem_limit = min(96 * 1024 * 1024, max(16 * 1024 * 1024, (vmem_cap * 3) // 4))
    block_budget = max(1 * 1024 * 1024, vmem_limit // 6)   # in+out bytes per grid step
    min_steps = 16 if vmem_cap < 100 * 1024 * 1024 else 8  # v7x: 2 TCs share the grid

    itemsize = x.dtype.itemsize
    per_d_bytes = 2 * H * W * (r * r) * itemsize            # input slab + output slab per d
    td = _pick_td(D, B * C * r, per_d_bytes, block_budget, min_steps)
    grid = (B * C, r, pl.cdiv(D, td))

    n_pass = 1 if x.dtype == jnp.bfloat16 else 3
    flops = int(2 * n_pass * B * C * (r ** 4) * D * H * W * W)
    bytes_accessed = int(2 * x.size * itemsize + s.size * 2)

    out6 = pl.pallas_call(
        functools.partial(_pixel_shuffle_kernel, r=r, td=td, h=H, w=W),
        out_shape=jax.ShapeDtypeStruct((B * C, D, r, H, W * r * r), x.dtype),
        grid=grid,
        in_specs=[
            pl.BlockSpec((None, r * r, td, H, W),
                         lambda bc, rd, db: (bc, rd, db, 0, 0)),
            pl.BlockSpec((r, W, r * W),
                         lambda bc, rd, db: (0, 0, 0)),      # resident scatter stack
        ],
        out_specs=pl.BlockSpec((None, td, None, H, W * r * r),
                               lambda bc, rd, db: (bc, db, rd, 0, 0)),
        compiler_params=pltpu.CompilerParams(
            dimension_semantics=("parallel", "parallel", "parallel"),
            vmem_limit_bytes=int(vmem_limit),
        ),
        cost_estimate=pl.CostEstimate(flops=flops, transcendentals=0,
                                      bytes_accessed=bytes_accessed),
    )(x6, s)

    # free reshape (no data movement): (B*C, D, r, H, r*W*r) is layout-identical to the
    # final (B, C, D*r, H*r, W*r) tensor.
    return out6.reshape(B, C, D * r, H * r, W * r)


def pixel_shuffle_3d_reference(x, r):
    # mirrors the PyTorch view/permute/view exactly (numpy)
    B, Crrr, D, H, W = x.shape
    C = Crrr // (r ** 3)
    y = x.reshape(B, C, r, r, r, D, H, W)
    y = np.transpose(y, (0, 1, 5, 2, 6, 3, 7, 4))
    return y.reshape(B, C, D * r, H * r, W * r)


if __name__ == "__main__":
    r = 2
    B, C, D, H, W = 2, 4, 4, 8, 16
    key = jax.random.PRNGKey(0)
    x = jax.random.normal(key, (B, C * r ** 3, D, H, W), jnp.float32)

    out = jax.block_until_ready(pixel_shuffle_3d(x, r))
    assert out.shape == (B, C, D * r, H * r, W * r), out.shape
    ref = pixel_shuffle_3d_reference(np.asarray(x), r)
    np.testing.assert_array_equal(np.asarray(out), ref)     # bit-exact permutation (f32)

    # lane-aligned store path (r*W == 128) + non-power-of-two channel count
    x2 = jax.random.normal(jax.random.PRNGKey(0), (1, 3 * r ** 3, 8, 8, 64), jnp.float32)
    out2 = jax.block_until_ready(pixel_shuffle_3d(x2, r))
    np.testing.assert_array_equal(np.asarray(out2),
                                  pixel_shuffle_3d_reference(np.asarray(x2), r))

    # bf16 path (single MXU pass), cubic volume
    x3 = jax.random.normal(jax.random.PRNGKey(0), (1, 2 * r ** 3, 4, 8, 16),
                           jnp.float32).astype(jnp.bfloat16)
    out3 = jax.block_until_ready(pixel_shuffle_3d(x3, r))
    np.testing.assert_array_equal(
        np.asarray(out3.astype(jnp.float32)),
        pixel_shuffle_3d_reference(np.asarray(x3.astype(jnp.float32)), r))

    print("KERNEL_OK")
</pallas_src>

<mosaic_0001>
module attributes {stable_mosaic.version = 11 : i64} {
  func.func @_pixel_shuffle_kernel(%arg0: i32, %arg1: i32, %arg2: i32, %arg3: memref<1x4x4x8x16xf32, #tpu.memory_space<vmem>>, %arg4: memref<2x16x32xbf16, #tpu.memory_space<vmem>>, %arg5: memref<1x4x1x8x64xf32, #tpu.memory_space<vmem>>) attributes {dimension_semantics = [#tpu.dimension_semantics<parallel>, #tpu.dimension_semantics<parallel>, #tpu.dimension_semantics<parallel>], iteration_bounds = array<i64: 8, 2, 1>, scalar_prefetch = 0 : i64, scratch_operands = 0 : i64, tpu.core_type = #tpu.core_type<tc>, window_params = [{transform_indices = @transform_0, window_bounds = array<i64: 1, 4, 4, 8, 16>}, {pipeline_mode = #tpu.pipeline_mode<synchronous>, transform_indices = @transform_1, window_bounds = array<i64: 2, 16, 32>}, {transform_indices = @transform_2, window_bounds = array<i64: 1, 4, 1, 8, 64>}]} {
    %c0 = arith.constant 0 : index
    %c0_0 = arith.constant 0 : index
    %c0_1 = arith.constant 0 : index
    %c0_2 = arith.constant 0 : index
    %c0_3 = arith.constant 0 : index
    %0 = vector.load %arg3[%c0, %c0_0, %c0_1, %c0_2, %c0_3] : memref<1x4x4x8x16xf32, #tpu.memory_space<vmem>>, vector<1x1x4x8x16xf32>
    %1 = vector.shape_cast %0 : vector<1x1x4x8x16xf32> to vector<4x8x16xf32>
    %2 = vector.shape_cast %1 : vector<4x8x16xf32> to vector<32x16xf32>
    %3 = arith.truncf %2 : vector<32x16xf32> to vector<32x16xbf16>
    %4 = arith.extf %3 : vector<32x16xbf16> to vector<32x16xf32>
    %5 = arith.subf %2, %4 : vector<32x16xf32>
    %6 = arith.truncf %5 : vector<32x16xf32> to vector<32x16xbf16>
    %7 = arith.extf %6 : vector<32x16xbf16> to vector<32x16xf32>
    %8 = arith.subf %5, %7 : vector<32x16xf32>
    %9 = arith.truncf %8 : vector<32x16xf32> to vector<32x16xbf16>
    %c0_4 = arith.constant 0 : index
    %c0_5 = arith.constant 0 : index
    %c0_6 = arith.constant 0 : index
    %10 = vector.load %arg4[%c0_4, %c0_5, %c0_6] : memref<2x16x32xbf16, #tpu.memory_space<vmem>>, vector<1x16x32xbf16>
    %11 = vector.shape_cast %10 : vector<1x16x32xbf16> to vector<16x32xbf16>
    %cst = arith.constant dense<0.000000e+00> : vector<32x32xf32>
    %12 = tpu.matmul %3, %11, %cst {dimension_numbers = #tpu.dot_dimension_numbers<[1], [0], [0], [1], [0, 0, 1, 1], [], []>} : vector<32x16xbf16>, vector<16x32xbf16>, vector<32x32xf32> -> vector<32x32xf32>
    %c0_7 = arith.constant 0 : index
    %c0_8 = arith.constant 0 : index
    %c0_9 = arith.constant 0 : index
    %13 = vector.load %arg4[%c0_7, %c0_8, %c0_9] : memref<2x16x32xbf16, #tpu.memory_space<vmem>>, vector<1x16x32xbf16>
    %14 = vector.shape_cast %13 : vector<1x16x32xbf16> to vector<16x32xbf16>
    %cst_10 = arith.constant dense<0.000000e+00> : vector<32x32xf32>
    %15 = tpu.matmul %6, %14, %cst_10 {dimension_numbers = #tpu.dot_dimension_numbers<[1], [0], [0], [1], [0, 0, 1, 1], [], []>} : vector<32x16xbf16>, vector<16x32xbf16>, vector<32x32xf32> -> vector<32x32xf32>
    %16 = arith.addf %12, %15 : vector<32x32xf32>
    %c0_11 = arith.constant 0 : index
    %c0_12 = arith.constant 0 : index
    %c0_13 = arith.constant 0 : index
    %17 = vector.load %arg4[%c0_11, %c0_12, %c0_13] : memref<2x16x32xbf16, #tpu.memory_space<vmem>>, vector<1x16x32xbf16>
    %18 = vector.shape_cast %17 : vector<1x16x32xbf16> to vector<16x32xbf16>
    %cst_14 = arith.constant dense<0.000000e+00> : vector<32x32xf32>
    %19 = tpu.matmul %9, %18, %cst_14 {dimension_numbers = #tpu.dot_dimension_numbers<[1], [0], [0], [1], [0, 0, 1, 1], [], []>} : vector<32x16xbf16>, vector<16x32xbf16>, vector<32x32xf32> -> vector<32x32xf32>
    %20 = arith.addf %16, %19 : vector<32x32xf32>
    %c0_15 = arith.constant 0 : index
    %c1 = arith.constant 1 : index
    %c0_16 = arith.constant 0 : index
    %c0_17 = arith.constant 0 : index
    %c0_18 = arith.constant 0 : index
    %21 = vector.load %arg3[%c0_15, %c1, %c0_16, %c0_17, %c0_18] : memref<1x4x4x8x16xf32, #tpu.memory_space<vmem>>, vector<1x1x4x8x16xf32>
    %22 = vector.shape_cast %21 : vector<1x1x4x8x16xf32> to vector<4x8x16xf32>
    %23 = vector.shape_cast %22 : vector<4x8x16xf32> to vector<32x16xf32>
    %24 = arith.truncf %23 : vector<32x16xf32> to vector<32x16xbf16>
    %25 = arith.extf %24 : vector<32x16xbf16> to vector<32x16xf32>
    %26 = arith.subf %23, %25 : vector<32x16xf32>
    %27 = arith.truncf %26 : vector<32x16xf32> to vector<32x16xbf16>
    %28 = arith.extf %27 : vector<32x16xbf16> to vector<32x16xf32>
    %29 = arith.subf %26, %28 : vector<32x16xf32>
    %30 = arith.truncf %29 : vector<32x16xf32> to vector<32x16xbf16>
    %c1_19 = arith.constant 1 : index
    %c0_20 = arith.constant 0 : index
    %c0_21 = arith.constant 0 : index
    %31 = vector.load %arg4[%c1_19, %c0_20, %c0_21] : memref<2x16x32xbf16, #tpu.memory_space<vmem>>, vector<1x16x32xbf16>
    %32 = vector.shape_cast %31 : vector<1x16x32xbf16> to vector<16x32xbf16>
    %cst_22 = arith.constant dense<0.000000e+00> : vector<32x32xf32>
    %33 = tpu.matmul %24, %32, %cst_22 {dimension_numbers = #tpu.dot_dimension_numbers<[1], [0], [0], [1], [0, 0, 1, 1], [], []>} : vector<32x16xbf16>, vector<16x32xbf16>, vector<32x32xf32> -> vector<32x32xf32>
    %34 = arith.addf %20, %33 : vector<32x32xf32>
    %c1_23 = arith.constant 1 : index
    %c0_24 = arith.constant 0 : index
    %c0_25 = arith.constant 0 : index
    %35 = vector.load %arg4[%c1_23, %c0_24, %c0_25] : memref<2x16x32xbf16, #tpu.memory_space<vmem>>, vector<1x16x32xbf16>
    %36 = vector.shape_cast %35 : vector<1x16x32xbf16> to vector<16x32xbf16>
    %cst_26 = arith.constant dense<0.000000e+00> : vector<32x32xf32>
    %37 = tpu.matmul %27, %36, %cst_26 {dimension_numbers = #tpu.dot_dimension_numbers<[1], [0], [0], [1], [0, 0, 1, 1], [], []>} : vector<32x16xbf16>, vector<16x32xbf16>, vector<32x32xf32> -> vector<32x32xf32>
    %38 = arith.addf %34, %37 : vector<32x32xf32>
    %c1_27 = arith.constant 1 : index
    %c0_28 = arith.constant 0 : index
    %c0_29 = arith.constant 0 : index
    %39 = vector.load %arg4[%c1_27, %c0_28, %c0_29] : memref<2x16x32xbf16, #tpu.memory_space<vmem>>, vector<1x16x32xbf16>
    %40 = vector.shape_cast %39 : vector<1x16x32xbf16> to vector<16x32xbf16>
    %cst_30 = arith.constant dense<0.000000e+00> : vector<32x32xf32>
    %41 = tpu.matmul %30, %40, %cst_30 {dimension_numbers = #tpu.dot_dimension_numbers<[1], [0], [0], [1], [0, 0, 1, 1], [], []>} : vector<32x16xbf16>, vector<16x32xbf16>, vector<32x32xf32> -> vector<32x32xf32>
    %42 = arith.addf %38, %41 : vector<32x32xf32>
    %c0_31 = arith.constant 0 : index
    %c2 = arith.constant 2 : index
    %c0_32 = arith.constant 0 : index
    %c0_33 = arith.constant 0 : index
    %c0_34 = arith.constant 0 : index
    %43 = vector.load %arg3[%c0_31, %c2, %c0_32, %c0_33, %c0_34] : memref<1x4x4x8x16xf32, #tpu.memory_space<vmem>>, vector<1x1x4x8x16xf32>
    %44 = vector.shape_cast %43 : vector<1x1x4x8x16xf32> to vector<4x8x16xf32>
    %45 = vector.shape_cast %44 : vector<4x8x16xf32> to vector<32x16xf32>
    %46 = arith.truncf %45 : vector<32x16xf32> to vector<32x16xbf16>
    %47 = arith.extf %46 : vector<32x16xbf16> to vector<32x16xf32>
    %48 = arith.subf %45, %47 : vector<32x16xf32>
    %49 = arith.truncf %48 : vector<32x16xf32> to vector<32x16xbf16>
    %50 = arith.extf %49 : vector<32x16xbf16> to vector<32x16xf32>
    %51 = arith.subf %48, %50 : vector<32x16xf32>
    %52 = arith.truncf %51 : vector<32x16xf32> to vector<32x16xbf16>
    %c0_35 = arith.constant 0 : index
    %c0_36 = arith.constant 0 : index
    %c0_37 = arith.constant 0 : index
    %53 = vector.load %arg4[%c0_35, %c0_36, %c0_37] : memref<2x16x32xbf16, #tpu.memory_space<vmem>>, vector<1x16x32xbf16>
    %54 = vector.shape_cast %53 : vector<1x16x32xbf16> to vector<16x32xbf16>
    %cst_38 = arith.constant dense<0.000000e+00> : vector<32x32xf32>
    %55 = tpu.matmul %46, %54, %cst_38 {dimension_numbers = #tpu.dot_dimension_numbers<[1], [0], [0], [1], [0, 0, 1, 1], [], []>} : vector<32x16xbf16>, vector<16x32xbf16>, vector<32x32xf32> -> vector<32x32xf32>
    %c0_39 = arith.constant 0 : index
    %c0_40 = arith.constant 0 : index
    %c0_41 = arith.constant 0 : index
    %56 = vector.load %arg4[%c0_39, %c0_40, %c0_41] : memref<2x16x32xbf16, #tpu.memory_space<vmem>>, vector<1x16x32xbf16>
    %57 = vector.shape_cast %56 : vector<1x16x32xbf16> to vector<16x32xbf16>
    %cst_42 = arith.constant dense<0.000000e+00> : vector<32x32xf32>
    %58 = tpu.matmul %49, %57, %cst_42 {dimension_numbers = #tpu.dot_dimension_numbers<[1], [0], [0], [1], [0, 0, 1, 1], [], []>} : vector<32x16xbf16>, vector<16x32xbf16>, vector<32x32xf32> -> vector<32x32xf32>
    %59 = arith.addf %55, %58 : vector<32x32xf32>
    %c0_43 = arith.constant 0 : index
    %c0_44 = arith.constant 0 : index
    %c0_45 = arith.constant 0 : index
    %60 = vector.load %arg4[%c0_43, %c0_44, %c0_45] : memref<2x16x32xbf16, #tpu.memory_space<vmem>>, vector<1x16x32xbf16>
    %61 = vector.shape_cast %60 : vector<1x16x32xbf16> to vector<16x32xbf16>
    %cst_46 = arith.constant dense<0.000000e+00> : vector<32x32xf32>
    %62 = tpu.matmul %52, %61, %cst_46 {dimension_numbers = #tpu.dot_dimension_numbers<[1], [0], [0], [1], [0, 0, 1, 1], [], []>} : vector<32x16xbf16>, vector<16x32xbf16>, vector<32x32xf32> -> vector<32x32xf32>
    %63 = arith.addf %59, %62 : vector<32x32xf32>
    %c0_47 = arith.constant 0 : index
    %c3 = arith.constant 3 : index
    %c0_48 = arith.constant 0 : index
    %c0_49 = arith.constant 0 : index
    %c0_50 = arith.constant 0 : index
    %64 = vector.load %arg3[%c0_47, %c3, %c0_48, %c0_49, %c0_50] : memref<1x4x4x8x16xf32, #tpu.memory_space<vmem>>, vector<1x1x4x8x16xf32>
    %65 = vector.shape_cast %64 : vector<1x1x4x8x16xf32> to vector<4x8x16xf32>
    %66 = vector.shape_cast %65 : vector<4x8x16xf32> to vector<32x16xf32>
    %67 = arith.truncf %66 : vector<32x16xf32> to vector<32x16xbf16>
    %68 = arith.extf %67 : vector<32x16xbf16> to vector<32x16xf32>
    %69 = arith.subf %66, %68 : vector<32x16xf32>
    %70 = arith.truncf %69 : vector<32x16xf32> to vector<32x16xbf16>
    %71 = arith.extf %70 : vector<32x16xbf16> to vector<32x16xf32>
    %72 = arith.subf %69, %71 : vector<32x16xf32>
    %73 = arith.truncf %72 : vector<32x16xf32> to vector<32x16xbf16>
    %c1_51 = arith.constant 1 : index
    %c0_52 = arith.constant 0 : index
    %c0_53 = arith.constant 0 : index
    %74 = vector.load %arg4[%c1_51, %c0_52, %c0_53] : memref<2x16x32xbf16, #tpu.memory_space<vmem>>, vector<1x16x32xbf16>
    %75 = vector.shape_cast %74 : vector<1x16x32xbf16> to vector<16x32xbf16>
    %cst_54 = arith.constant dense<0.000000e+00> : vector<32x32xf32>
    %76 = tpu.matmul %67, %75, %cst_54 {dimension_numbers = #tpu.dot_dimension_numbers<[1], [0], [0], [1], [0, 0, 1, 1], [], []>} : vector<32x16xbf16>, vector<16x32xbf16>, vector<32x32xf32> -> vector<32x32xf32>
    %77 = arith.addf %63, %76 : vector<32x32xf32>
    %c1_55 = arith.constant 1 : index
    %c0_56 = arith.constant 0 : index
    %c0_57 = arith.constant 0 : index
    %78 = vector.load %arg4[%c1_55, %c0_56, %c0_57] : memref<2x16x32xbf16, #tpu.memory_space<vmem>>, vector<1x16x32xbf16>
    %79 = vector.shape_cast %78 : vector<1x16x32xbf16> to vector<16x32xbf16>
    %cst_58 = arith.constant dense<0.000000e+00> : vector<32x32xf32>
    %80 = tpu.matmul %70, %79, %cst_58 {dimension_numbers = #tpu.dot_dimension_numbers<[1], [0], [0], [1], [0, 0, 1, 1], [], []>} : vector<32x16xbf16>, vector<16x32xbf16>, vector<32x32xf32> -> vector<32x32xf32>
    %81 = arith.addf %77, %80 : vector<32x32xf32>
    %c1_59 = arith.constant 1 : index
    %c0_60 = arith.constant 0 : index
    %c0_61 = arith.constant 0 : index
    %82 = vector.load %arg4[%c1_59, %c0_60, %c0_61] : memref<2x16x32xbf16, #tpu.memory_space<vmem>>, vector<1x16x32xbf16>
    %83 = vector.shape_cast %82 : vector<1x16x32xbf16> to vector<16x32xbf16>
    %cst_62 = arith.constant dense<0.000000e+00> : vector<32x32xf32>
    %84 = tpu.matmul %73, %83, %cst_62 {dimension_numbers = #tpu.dot_dimension_numbers<[1], [0], [0], [1], [0, 0, 1, 1], [], []>} : vector<32x16xbf16>, vector<16x32xbf16>, vector<32x32xf32> -> vector<32x32xf32>
    %85 = arith.addf %81, %84 : vector<32x32xf32>
    %86 = tpu.concatenate %42, %85 in 1 : vector<32x32xf32>, vector<32x32xf32> -> vector<32x64xf32>
    %87 = vector.shape_cast %86 : vector<32x64xf32> to vector<4x8x64xf32>
    %c0_63 = arith.constant 0 : index
    %c0_64 = arith.constant 0 : index
    %c0_65 = arith.constant 0 : index
    %c0_66 = arith.constant 0 : index
    %c0_67 = arith.constant 0 : index
    %88 = vector.load %arg5[%c0_63, %c0_64, %c0_65, %c0_66, %c0_67] : memref<1x4x1x8x64xf32, #tpu.memory_space<vmem>>, vector<1x4x1x8x64xf32>
    %89 = vector.shape_cast %88 : vector<1x4x1x8x64xf32> to vector<4x8x64xf32>
    %90 = vector.shape_cast %87 : vector<4x8x64xf32> to vector<1x4x1x8x64xf32>
    tpu.vector_store %arg5[%c0_63, %c0_64, %c0_65, %c0_66, %c0_67], %90 {strides = array<i32>} : memref<1x4x1x8x64xf32, #tpu.memory_space<vmem>>, vector<1x4x1x8x64xf32>,
    return
  }
  func.func @transform_0(%arg0: i32, %arg1: i32, %arg2: i32) -> (i32, i32, i32, i32, i32) {
    %c0_i32 = arith.constant 0 : i32
    %c0_i32_0 = arith.constant 0 : i32
    %c0_i32_1 = arith.constant 0 : i32
    return %arg0, %arg1, %arg2, %c0_i32, %c0_i32_0 : i32, i32, i32, i32, i32
  }
  func.func @transform_1(%arg0: i32, %arg1: i32, %arg2: i32) -> (i32, i32, i32) {
    %c0_i32 = arith.constant 0 : i32
    %c0_i32_0 = arith.constant 0 : i32
    %c0_i32_1 = arith.constant 0 : i32
    %c0_i32_2 = arith.constant 0 : i32
    return %c0_i32, %c0_i32_0, %c0_i32_1 : i32, i32, i32
  }
  func.func @transform_2(%arg0: i32, %arg1: i32, %arg2: i32) -> (i32, i32, i32, i32, i32) {
    %c0_i32 = arith.constant 0 : i32
    %c0_i32_0 = arith.constant 0 : i32
    %c0_i32_1 = arith.constant 0 : i32
    return %arg0, %arg2, %arg1, %c0_i32, %c0_i32_0 : i32, i32, i32, i32, i32
  }
}

</mosaic_0001>

<bundles_post_ra>
// kernel: pixel_shuffle_3d.1
= control target key start
LH: loop header
LB: loop body
LE: loop exit
PB: predicated region body
PF: predicated region fallthrough
CT: control target
= control target key end

     0   :  { %s1514_s9 = smov 0   ;;  %s1516_s10 = smov 0   ;;  %s1684_s0 = inlined_call_operand.vmem [shape: f32[8,8,4,8,16], index: 0, kind: input, shape index: {}]   ;;  %s1685_s1 = inlined_call_operand.vmem [shape: bf16[2,16,32], index: 1, kind: input, shape index: {}]   ;;  %s1686_s2 = inlined_call_operand.vmem [shape: f32[8,4,2,8,64], index: 2, kind: output, shape index: {}]  }
   0x1   :  { %s1518_s11 = smov 0   ;;  %s1520_s12 = smov 0  }
   0x2   :  { %s1522_s13 = smov 0   ;;  %s1524_s14 = smov 0  }
   0x3   :  { %s1526_s15 = smov 0  }
   0x4 LB: > { %s27_s16 = sadd.s32 1, %s1488_s13  ;;  %s31_s17 = sadd.s32 1, %s1492_s14  ;;  %s1496_s15 = sphi %s1526_s15, %s12_s15   ;;  %s1492_s14 = sphi %s1524_s14, %s1693_s14   ;;  %s1488_s13 = sphi %s1522_s13, %s1692_s13   ;;  %s1484_s12 = sphi %s1520_s12, %s1691_s12   ;;  %s1480_s11 = sphi %s1518_s11, %s1690_s11   ;;  %s1476_s10 = sphi %s1516_s10, %s1689_s10   ;;  %s1472_s9 = sphi %s1514_s9, %s1688_s9  }
   0x5   : > { %p29_p0 = scmp.ge.s32.totalorder %s27_s16, 2  ;;  %s1180_s18 = sadd.s32 4294967295, %s1496_s15  }
   0x6   : > { %p103_p1 = scmp.ne.s32.totalorder %s1476_s10, %s1472_s9  ;;  %p104_p2 = scmp.eq.s32.totalorder %s1180_s18, 15 }
   0x7   : > { %s1695_s16 = smov (%p29_p0, %s27_s16), 0  ;;  %s1697_s17 = smov (!%p29_p0, %s31_s17), %s1492_s14 }
   0x8   : > { %s89_s19 = ssub.s32 %s1488_s13, %s1695_s16  ;;  %p33_p3 = scmp.ge.s32.totalorder %s1697_s17, 8 }
   0x9   : > { %p1184_p4 = scmp.ge.s32.totalorder %s1496_s15, 1  ;;  %p1560_p5 = por %p104_p2, %p103_p1 }
   0xa   : > { %p150_p6 = scmp.lt.s32.totalorder %s1496_s15, 17  ;;  %s1699_s17 = smov (%p33_p3, %s1697_s17), 0 }
   0xb   : > { %s86_s21 = ssub.s32 %s1492_s14, %s1699_s17  ;;  %s93_s23 = sadd.s32 1, %s1476_s10 }
   0xc   : > { %p151_p7 = pnand %p1184_p4, %p150_p6  ;;  %s90_s22 = sor.u32 %s89_s19, %s86_s21 }
   0xd   : > { %p91_p8 = scmp.eq.s32.totalorder %s90_s22, 0  ;;  %v1576_v0 = vld [vmem:[%s1685_s1] sm:$0xff] (!%p151_p7)   ;;  %s1186_s27 = sshll.u32 (!%p151_p7), %s1480_s11, 2  ;;  %vm232_vm0 = vcmask (!%p151_p7), 130048   ;;  %v1613_v40 = vld [vmem:[%s1685_s1 + $0x8] sm:$0xff] (!%p151_p7)   ;;  %vm1031_vm1 = vcmask (!%p151_p7), 261120  }
   0xe   : > { %154 = sbr.rel (%p151_p7) target bundleno = 439 (0x1b7), region = 28  ;;  %p182_p9 = scmp.lt.s32.totalorder (!%p151_p7), %s1484_s12, 7  ;;  %1307 = vmatprep.subr.bf16.mxu1 (!%p151_p7), %v1576_v0  ;;  %1271 = vmatprep.subr.bf16.mxu0 (!%p151_p7), %v1576_v0  ;;  %vm1036_vm2 = vcmask (!%p151_p7), 523264  }
   0xf   : > { %s1571_s24 = scalar_select %p91_p8, %s1476_s10, %s93_s23  }
  0x10   : > { %p184_p10 = scmp.lt.s32.totalorder (!%p151_p7), %s1186_s27, 7  ;;  %1308 = vmatpush3.bf16.msra.mxu1 (!%p151_p7), %v1576_v0  ;;  %1272 = vmatpush3.bf16.msra.mxu0 (!%p151_p7), %v1576_v0  ;;  %s1498_s19 = smov (!%p151_p7), 32  }
  0x11   : > { %1313 = vmatprep.subr.bf16.mxu1 (!%p151_p7), %v1576_v0  ;;  %1277 = vmatprep.subr.bf16.mxu0 (!%p151_p7), %v1576_v0  ;;  %s177_s21 = sand.u32 (!%p151_p7), 1, %s1472_s9  }
  0x12   : > { %s1185_s22 = sshll.u32 (!%p151_p7), %s177_s21, 5 }
  0x13   : > { %s179_s23 = scalar_lea.vmem (!%p151_p7), [#allocation2], %s1185_s22 }
  0x15   : > { %s183_s28 = scalar_select %p182_p9, %s1484_s12, 7 }
  0x16   : > { %s1701_s27 = smov (!%p184_p10, %s1186_s27), 7  ;;  %s1231_s9 = sshll.u32 (%p1560_p5), %s1484_s12, 3 }
  0x17   : > { %s1188_s29 = sshll.u32 %s183_s28, 5  ;;  %s1187_s30 = sshll.u32 %s1701_s27, 2 }
  0x18   : > { %s191_s3 = sadd.s32 %s1188_s29, %s1187_s30  ;;  %s1052_s25 = sadd.s32 (%p1560_p5), %s1480_s11, %s1231_s9 }
  0x19   : > { %s1189_s4 = sshll.u32 %s191_s3, 3  ;;  %s1232_s26 = sshll.u32 (%p1560_p5), %s1052_s25, 3 }
  0x1a   : > { %s1590_s7 = scalar_lea.vmem %s1684_s0, %s1189_s4  ;;  %s1054_s29 = scalar_lea.vmem (%p1560_p5), %s1686_s2, %s1232_s26 }
  0x1b   : > { %v1210_v1 = vld [vmem:[%s1590_s7 + $0x40] sm:$0xff]  ;;  %v1211_v2 = vld [vmem:[%s1590_s7 + $0x48] sm:$0xff]  ;;  %v1212_v3 = vld [vmem:[%s1590_s7 + $0x50] sm:$0xff] }
  0x1c   : > { %v620_v4 = vpack.c.bf16 %v1211_v2, %v1210_v1  ;;  %v1213_v5 = vld [vmem:[%s1590_s7 + $0x58] sm:$0xff]  ;;  %v198_v11 = vld [vmem:[%s1590_s7] sm:$0xff]  ;;  %v199_v12 = vld [vmem:[%s1590_s7 + $0x8] sm:$0xff] }
  0x1d   : > { %v621_v6 = vpack.c.bf16 %v1213_v5, %v1212_v3  ;;  %v200_v15 = vld [vmem:[%s1590_s7 + $0x10] sm:$0xff]  ;;  %v201_v16 = vld [vmem:[%s1590_s7 + $0x18] sm:$0xff]  ;;  %v202_v20 = vpack.c.bf16 %v199_v12, %v198_v11  ;;  %v1220_v48 = vld [vmem:[%s1590_s7 + $0x60] sm:$0xff] }
  0x1e   : > { %v622_v7 = vunpack.c.l.bf16 %v620_v4  ;;  %v623_v8 = vunpack.c.h.bf16 %v620_v4  ;;  %v203_v22 = vpack.c.bf16 %v201_v16, %v200_v15  ;;  %v1221_v49 = vld [vmem:[%s1590_s7 + $0x68] sm:$0xff]  ;;  %v1197_v58 = vld [vmem:[%s1590_s7 + $0x20] sm:$0xff]  ;;  %v1222_v62 = vld [vmem:[%s1590_s7 + $0x70] sm:$0xff] }
  0x1f   : > { %v624_v9 = vunpack.c.l.bf16 %v621_v6  ;;  %v625_v10 = vunpack.c.h.bf16 %v621_v6  ;;  %v204_v23 = vunpack.c.l.bf16 %v202_v20  ;;  %v205_v24 = vunpack.c.h.bf16 %v202_v20  ;;  %v1198_v59 = vld [vmem:[%s1590_s7 + $0x28] sm:$0xff]  ;;  %v1223_v63 = vld [vmem:[%s1590_s7 + $0x78] sm:$0xff] }
  0x20   : > { %v626_v13 = vsub.f32 %v1210_v1, %v622_v7  ;;  %v627_v14 = vsub.f32 %v1211_v2, %v623_v8  ;;  %v206_v25 = vunpack.c.l.bf16 %v203_v22  ;;  %v207_v29 = vunpack.c.h.bf16 %v203_v22  ;;  %v1199_v8 = vld [vmem:[%s1590_s7 + $0x30] sm:$0xff] }
  0x21   : > { %v628_v17 = vsub.f32 %v1212_v3, %v624_v9  ;;  %v629_v18 = vsub.f32 %v1213_v5, %v625_v10  ;;  %v208_v28 = vsub.f32 %v198_v11, %v204_v23  ;;  %v209_v30 = vsub.f32 %v199_v12, %v205_v24  ;;  %v1200_v9 = vld [vmem:[%s1590_s7 + $0x38] sm:$0xff] }
  0x22   : > { %v630_v19 = vpack.c.bf16 %v627_v14, %v626_v13  ;;  %v210_v31 = vsub.f32 %v200_v15, %v206_v25  ;;  %v211_v32 = vsub.f32 %v201_v16, %v207_v29  ;;  %v816_v53 = vpack.c.bf16 %v1221_v49, %v1220_v48 }
  0x23   : > { %v631_v21 = vpack.c.bf16 %v629_v18, %v628_v17  ;;  %v212_v33 = vpack.c.bf16 %v209_v30, %v208_v28  ;;  %v407_v61 = vpack.c.bf16 %v1198_v59, %v1197_v58  ;;  %v817_v2 = vpack.c.bf16 %v1223_v63, %v1222_v62 }
  0x24   : > { %1309 = vmatprep.mubr.msk.bf16.mxu1 %vm232_vm0, %v630_v19  ;;  %v632_v26 = vunpack.c.l.bf16 %v630_v19  ;;  %v633_v27 = vunpack.c.h.bf16 %v630_v19  ;;  %v213_v36 = vpack.c.bf16 %v211_v32, %v210_v31  ;;  %v818_v56 = vunpack.c.l.bf16 %v816_v53 }
  0x25   : > { %1310 = vmatmul.mubr.msk.bf16.vlgmr.msra.gmra.mrb[0].mxu1 %vm232_vm0, %v631_v21  ;;  %1273 = vmatprep.mubr.msk.bf16.mxu0 %vm232_vm0, %v212_v33  ;;  %v214_v37 = vunpack.c.l.bf16 %v212_v33  ;;  %v215_v38 = vunpack.c.h.bf16 %v212_v33  ;;  %v634_v41 = vunpack.c.l.bf16 %v631_v21  ;;  %v635_v42 = vunpack.c.h.bf16 %v631_v21 }
  0x26   : > { %1314 = vmatpush3.bf16.msra.mxu1 %v1576_v0  ;;  %1315 = vmatprep.mubr.msk.bf16.mxu1 %vm232_vm0, %v620_v4  ;;  %v636_v34 = vsub.f32 %v626_v13, %v632_v26  ;;  %v637_v35 = vsub.f32 %v627_v14, %v633_v27  ;;  %v216_v50 = vunpack.c.l.bf16 %v213_v36  ;;  %v217_v51 = vunpack.c.h.bf16 %v213_v36 }
  0x27   : > { %1319 = vmatprep.subr.bf16.mxu1 %v1576_v0  ;;  %1274 = vmatmul.mubr.msk.bf16.vlgmr.msra.gmra.mrb[0].mxu0 %vm232_vm0, %v213_v36  ;;  %v218_v43 = vsub.f32 %v208_v28, %v214_v37  ;;  %v219_v44 = vsub.f32 %v209_v30, %v215_v38  ;;  %v638_v45 = vsub.f32 %v628_v17, %v634_v41  ;;  %v819_v57 = vunpack.c.h.bf16 %v816_v53 }
  0x28   : > { %1278 = vmatpush3.bf16.msra.mxu0 %v1576_v0  ;;  %1279 = vmatprep.mubr.msk.bf16.mxu0 %vm232_vm0, %v202_v20  ;;  %v640_v39 = vpack.c.bf16 %v637_v35, %v636_v34  ;;  %v639_v46 = vsub.f32 %v629_v18, %v635_v42  ;;  %v220_v54 = vsub.f32 %v210_v31, %v216_v50  ;;  %v409_v3 = vunpack.c.l.bf16 %v407_v61 }
  0x29   : > { %1283 = vmatprep.subr.bf16.mxu0 %v1576_v0  ;;  %v222_v47 = vpack.c.bf16 %v219_v44, %v218_v43  ;;  %v221_v55 = vsub.f32 %v211_v32, %v217_v51  ;;  %v823_v1 = vsub.f32 %v1221_v49, %v819_v57  ;;  %v410_v4 = vunpack.c.h.bf16 %v407_v61 }
  0x2a   : > { %v641_v52 = vpack.c.bf16 %v639_v46, %v638_v45  ;;  %v821_v7 = vunpack.c.h.bf16 %v817_v2  ;;  %v413_v10 = vsub.f32 %v1197_v58, %v409_v3  ;;  %v408_v14 = vpack.c.bf16 %v1200_v9, %v1199_v8 }
  0x2b   : > { %v223_v60 = vpack.c.bf16 %v221_v55, %v220_v54  ;;  %v414_v11 = vsub.f32 %v1198_v59, %v410_v4 }
  0x2c   : > { %v825_v16 = vsub.f32 %v1223_v63, %v821_v7  ;;  %v411_v20 = vunpack.c.l.bf16 %v408_v14  ;;  %v412_v21 = vunpack.c.h.bf16 %v408_v14 }
  0x2d   : > { %v417_v17 = vpack.c.bf16 %v414_v11, %v413_v10 }
  0x2e   : > { %v415_v26 = vsub.f32 %v1199_v8, %v411_v20  ;;  %v416_v27 = vsub.f32 %v1200_v9, %v412_v21 }
  0x2f   : > { %v419_v23 = vunpack.c.l.bf16 %v417_v17  ;;  %v420_v24 = vunpack.c.h.bf16 %v417_v17 }
  0x30   : > { %v418_v32 = vpack.c.bf16 %v416_v27, %v415_v26 }
  0x31   : > { %1316 = vmatmul.mubr.msk.bf16.vlgmr.msra.gmra.mrb[0].mxu1 %vm232_vm0, %v621_v6  ;;  %v820_v6 = vunpack.c.l.bf16 %v817_v2  ;;  %v423_v30 = vsub.f32 %v413_v10, %v419_v23  ;;  %v424_v31 = vsub.f32 %v414_v11, %v420_v24 }
  0x32   : > { %1320 = vmatpush3.bf16.msra.mxu1 %v1576_v0  ;;  %1321 = vmatprep.mubr.msk.bf16.mxu1 %vm232_vm0, %v640_v39  ;;  %v421_v36 = vunpack.c.l.bf16 %v418_v32  ;;  %v422_v37 = vunpack.c.h.bf16 %v418_v32 }
  0x33   : > { %1325 = vmatprep.subr.bf16.mxu1 %v1613_v40  ;;  %1280 = vmatmul.mubr.msk.bf16.vlgmr.msra.gmra.mrb[0].mxu0 %vm232_vm0, %v203_v22  ;;  %v824_v15 = vsub.f32 %v1222_v62, %v820_v6  ;;  %v427_v35 = vpack.c.bf16 %v424_v31, %v423_v30 }
  0x34   : > { %1284 = vmatpush3.bf16.msra.mxu0 %v1576_v0  ;;  %1285 = vmatprep.mubr.msk.bf16.mxu0 %vm232_vm0, %v222_v47  ;;  %v822_v0 = vsub.f32 %v1220_v48, %v818_v56  ;;  %v425_v39 = vsub.f32 %v415_v26, %v421_v36  ;;  %v426_v41 = vsub.f32 %v416_v27, %v422_v37 }
  0x35   : > { %1289 = vmatprep.subr.bf16.mxu0 %v1613_v40  ;;  %v827_v22 = vpack.c.bf16 %v825_v16, %v824_v15 }
  0x36   : > { %v826_v5 = vpack.c.bf16 %v823_v1, %v822_v0  ;;  %v428_v42 = vpack.c.bf16 %v426_v41, %v425_v39 }
  0x37   : > { %v830_v28 = vunpack.c.l.bf16 %v827_v22  ;;  %v831_v29 = vunpack.c.h.bf16 %v827_v22 }
  0x38   : > { %v828_v12 = vunpack.c.l.bf16 %v826_v5  ;;  %v829_v13 = vunpack.c.h.bf16 %v826_v5 }
  0x39   : > { %v834_v33 = vsub.f32 %v824_v15, %v830_v28  ;;  %v835_v34 = vsub.f32 %v825_v16, %v831_v29 }
  0x3a   : > { %v832_v18 = vsub.f32 %v822_v0, %v828_v12  ;;  %v833_v19 = vsub.f32 %v823_v1, %v829_v13 }
  0x3b   : > { %v837_v38 = vpack.c.bf16 %v835_v34, %v834_v33 }
  0x3c   : > { %v836_v25 = vpack.c.bf16 %v833_v19, %v832_v18 }
  0x3d   : > { %1322 = vmatmul.mubr.msk.bf16.vlgmr.msra.gmra.mrb[0].mxu1 %vm232_vm0, %v641_v52 }
  0x3e   : > { %1326 = vmatpush3.bf16.msra.mxu1 %v1613_v40  ;;  %1327 = vmatprep.mubr.msk.bf16.mxu1 %vm232_vm0, %v816_v53 }
  0x3f   : > { %1331 = vmatprep.subr.bf16.mxu1 %v1613_v40  ;;  %1286 = vmatmul.mubr.msk.bf16.vlgmr.msra.gmra.mrb[0].mxu0 %vm232_vm0, %v223_v60 }
  0x40   : > { %1290 = vmatpush3.bf16.msra.mxu0 %v1613_v40  ;;  %1291 = vmatprep.mubr.msk.bf16.mxu0 %vm232_vm0, %v407_v61 }
  0x41   : > { %1295 = vmatprep.subr.bf16.mxu0 %v1613_v40 }
  0x49   : > { %1328 = vmatmul.mubr.msk.bf16.vlgmr.msra.gmra.mrb[0].mxu1 %vm232_vm0, %v817_v2 }
  0x4a   : > { %1332 = vmatpush3.bf16.msra.mxu1 %v1613_v40  ;;  %1333 = vmatprep.mubr.msk.bf16.mxu1 %vm232_vm0, %v826_v5 }
  0x4b   : > { %1337 = vmatprep.subr.bf16.mxu1 %v1613_v40  ;;  %1292 = vmatmul.mubr.msk.bf16.vlgmr.msra.gmra.mrb[0].mxu0 %vm232_vm0, %v408_v14 }
  0x4c   : > { %1296 = vmatpush3.bf16.msra.mxu0 %v1613_v40  ;;  %1297 = vmatprep.mubr.msk.bf16.mxu0 %vm232_vm0, %v417_v17 }
  0x4d   : > { %1301 = vmatprep.subr.bf16.mxu0 %v1613_v40 }
  0x55   : > { %1334 = vmatmul.mubr.msk.bf16.vlgmr.msra.gmra.mrb[0].mxu1 %vm232_vm0, %v827_v22 }
  0x56   : > { %1338 = vmatpush3.bf16.msra.mxu1 %v1613_v40  ;;  %1339 = vmatprep.mubr.msk.bf16.mxu1 %vm232_vm0, %v836_v25 }
  0x57   : > { %1298 = vmatmul.mubr.msk.bf16.vlgmr.msra.gmra.mrb[0].mxu0 %vm232_vm0, %v418_v32 }
  0x58   : > { %1302 = vmatpush3.bf16.msra.mxu0 %v1613_v40  ;;  %1303 = vmatprep.mubr.msk.bf16.mxu0 %vm232_vm0, %v427_v35 }
  0x61   : > { %1340 = vmatmul.mubr.msk.bf16.vlgmr.msra.gmra.mrb[0].mxu1 %vm232_vm0, %v837_v38 }
  0x63   : > { %1304 = vmatmul.mubr.msk.bf16.vlgmr.msra.gmra.mrb[0].mxu0 %vm232_vm0, %v428_v42 }
 0x134   : > { %v1341_v43 = vpop.f32.mrb[0].mxu1 }
 0x135   : > { %1023 = vrot.lane.b32.xlu1 %v1341_v43, %s1498_s19  ;;  %v996_v44 = vpop.f32.mrb[1].mxu1 }
 0x136   : > { %1019 = vrot.lane.b32.xlu0 %v996_v44, %s1498_s19  ;;  %v1342_v45 = vpop.f32.mrb[2].mxu1  ;;  %v1305_v40 = vpop.f32.mrb[0].mxu0 }
 0x137   : > { %v999_v46 = vpop.f32.mrb[3].mxu1  ;;  %v596_v47 = vpop.f32.mrb[1].mxu0 }
 0x138   : > { %v1306_v48 = vpop.f32.mrb[2].mxu0 }
 0x139   : > { %1025 = vrot.lane.b32.xlu1 %v1342_v45, %s1498_s19  ;;  %v599_v49 = vpop.f32.mrb[3].mxu0 }
 0x13a   : > { %1021 = vrot.lane.b32.xlu0 %v999_v46, %s1498_s19 }
 0x1a7   : > { %v1024_v50 = vpop.permute.xlu1 %1023 }
 0x1a8   : > { %v1034_v51 = vsel %vm1031_vm1, %v1305_v40, %v1024_v50  ;;  %v1020_v52 = vpop.permute.xlu0 %1019  ;;  %1047 = sbr.rel (!%p1560_p5) target bundleno = 439 (0x1b7), region = 32 }
 0x1a9   : > { %1039 = vst.msk [vmem:[%s179_s23 + $0x10] sm:$0xff] %vm1036_vm2, %v1034_v51  ;;  %v1032_v53 = vsel %vm1031_vm1, %v596_v47, %v1020_v52 }
 0x1aa   : > { %1037 = vst.msk [vmem:[%s179_s23] sm:$0xff] %vm1036_vm2, %v1032_v53 }
 0x1ab   : > { %v1026_v54 = vpop.permute.xlu1 %1025 }
 0x1ac   : > { %v1035_v55 = vsel %vm1031_vm1, %v1306_v48, %v1026_v54  ;;  %v1022_v56 = vpop.permute.xlu0 %1021 }
 0x1ad   : > { %1040 = vst.msk [vmem:[%s179_s23 + $0x18] sm:$0xff] %vm1036_vm2, %v1035_v55  ;;  %v1033_v57 = vsel %vm1031_vm1, %v599_v49, %v1022_v56 }
 0x1ae   : > { %1038 = vst.msk [vmem:[%s179_s23 + $0x8] sm:$0xff] %vm1036_vm2, %v1033_v57 }
 0x1b0   : > { %v1092_v60 = vld [vmem:[%s179_s23 + $0x10] sm:$0xff] }
 0x1b1   : > { %v1088_v58 = vld [vmem:[%s179_s23] sm:$0xff]  ;;  %1093 = vst [vmem:[%s1054_s29 + $0x20] sm:$0xff] %v1092_v60 }
 0x1b2   : > { %1089 = vst [vmem:[%s1054_s29] sm:$0xff] %v1088_v58 }
 0x1b4   : > { %v1094_v61 = vld [vmem:[%s179_s23 + $0x18] sm:$0xff] }
 0x1b5   : > { %v1090_v59 = vld [vmem:[%s179_s23 + $0x8] sm:$0xff]  ;;  %1095 = vst [vmem:[%s1054_s29 + $0x30] sm:$0xff] %v1094_v61 }
 0x1b6   : > { %1091 = vst [vmem:[%s1054_s29 + $0x10] sm:$0xff] %v1090_v59 }
 0x1b7 PF: > { %s12_s15 = sadd.s32 1, %s1496_s15   ;;  %s1688_s9 = smov %s1476_s10 }
 0x1b8   : > { %p9_p11 = scmp.ge.s32.totalorder %s12_s15, 18   ;;  %s1689_s10 = smov %s1571_s24 }
 0x1b9   : > { %s1690_s11 = smov %s1488_s13  ;;  %s1691_s12 = smov %s1492_s14 }
 0x1ba   : > { %s1692_s13 = smov %s1695_s16  ;;  %s1693_s14 = smov %s1699_s17 }
 0x1bb   :  { %11 = sbr.rel (!%p9_p11) target bundleno = 4 (0x4), region = 100 }

</bundles_post_ra>
